<compile_context>
chip_gen: v5e
topology: v5e:2x2
jax: 0.10.0
libtpu: 0.0.40
codegen_flags: <defaults>
</compile_context>

<pallas_src>
import jax
import jax.numpy as jnp
from jax.experimental import pallas as pl
from jax.experimental.pallas import tpu as pltpu

_HP = 128   # hidden (120) padded to one full 128-lane vreg
_AP = 128   # action dim padded so output stores are unmasked (lane-dense out_spec)


def _dqn_kernel(x_ref, w1_ref, w3_ref, out_ref):
    """One batch tile of the DQN forward.

    x_ref  : [bt, S]      states (S = state_dim, tiny)
    w1_ref : [S+1, 128]   fc1 weight rows 0..S-1, fc1 bias in row S;
                          bias row's lane 127 is 1.0 -> constant-1 hidden lane
    w3_ref : [128, 128]   fc3 weight rows 0..119, fc3 bias in row 127
    out_ref: [bt, 128]    Q-values live in columns [:action_dim]
    """
    x = x_ref[...]
    w1 = w1_ref[...]
    s = x.shape[1]

    # Layer 1 on the VPU: K=2 is far too small for the MXU, so compute it as
    # rank-1 FMAs (outer products).  Bias is the last row of w1p.
    h = x[:, 0:1] * w1[0:1, :]
    for k in range(1, s):                     # s is static -> fully unrolled
        h = h + x[:, k:k + 1] * w1[k:k + 1, :]
    h = h + w1[s:s + 1, :]                    # fc1 bias, broadcast over batch
    h = jnp.maximum(h, 0.0)                   # padded lanes: relu(0)=0, lane127: relu(1)=1

    # Layer 2 on the MXU: K = 128 (padded).  fc3 bias is carried by the
    # constant-1 hidden lane, so no separate bias add / extra input is needed.
    out_ref[...] = jnp.dot(h, w3_ref[...],
                           preferred_element_type=jnp.float32).astype(out_ref.dtype)


def _pack_params(w1, b1, w3, b3):
    """Zero-pad to lane-dense shapes and fold both biases into the weights."""
    S, H = w1.shape
    A = w3.shape[1]
    assert H <= _HP - 1, "need one spare hidden lane for the fc3 bias trick"
    assert A <= _AP

    w1p = jnp.zeros((S + 1, _HP), jnp.float32)
    w1p = w1p.at[:S, :H].set(w1.astype(jnp.float32))
    w1p = w1p.at[S, :H].set(b1.reshape(-1).astype(jnp.float32))
    w1p = w1p.at[S, _HP - 1].set(1.0)         # constant-1 hidden lane

    w3p = jnp.zeros((_HP, _AP), jnp.float32)
    w3p = w3p.at[:H, :A].set(w3.astype(jnp.float32))
    w3p = w3p.at[_HP - 1, :A].set(b3.reshape(-1).astype(jnp.float32))
    return w1p, w3p


def dqn_forward(x, w1, b1, w3, b3, *, block_b=256):
    """DQN forward pass: relu(x @ w1 + b1) @ w3 + b3, computed in Pallas.

    x:  [B, state_dim] f32, w1: [state_dim, 120], b1: [120],
    w3: [120, action_dim], b3: [action_dim].  Returns [B, action_dim] f32.
    """
    B, S = x.shape
    A = w3.shape[1]
    w1p, w3p = _pack_params(w1, b1, w3, b3)

    def round_up(a, m):
        return (a + m - 1) // m * m

    # Batch tile: multiple of 8 (sublane), capped at block_b; pad B up to it.
    bt = min(block_b, round_up(B, 8))
    Bp = round_up(B, bt)
    if Bp != B:
        x = jnp.pad(x, ((0, Bp - B), (0, 0)))

    out = pl.pallas_call(
        _dqn_kernel,
        out_shape=jax.ShapeDtypeStruct((Bp, _AP), jnp.float32),
        grid=(Bp // bt,),
        in_specs=[
            pl.BlockSpec((bt, S), lambda i: (i, 0)),        # batch-tiled states
            pl.BlockSpec((S + 1, _HP), lambda i: (0, 0)),   # resident packed fc1 (+bias)
            pl.BlockSpec((_HP, _AP), lambda i: (0, 0)),     # resident packed fc3 (+bias)
        ],
        out_specs=pl.BlockSpec((bt, _AP), lambda i: (i, 0)),  # lane-dense output
        compiler_params=pltpu.CompilerParams(
            dimension_semantics=("parallel",)),  # batch shards across TCs on v7x
    )(x, w1p, w3p)

    return out[:B, :A]


def init_params(key, state_dim, action_dim, hidden=120):
    """Deterministic init mimicking torch.nn.Linear's uniform init."""
    k1, k2, k3, k4 = jax.random.split(key, 4)
    bound1 = 1.0 / jnp.sqrt(state_dim)
    bound3 = 1.0 / jnp.sqrt(hidden)
    w1 = jax.random.uniform(k1, (state_dim, hidden), jnp.float32, -bound1, bound1)
    b1 = jax.random.uniform(k2, (hidden,), jnp.float32, -bound1, bound1)
    w3 = jax.random.uniform(k3, (hidden, action_dim), jnp.float32, -bound3, bound3)
    b3 = jax.random.uniform(k4, (action_dim,), jnp.float32, -bound3, bound3)
    return w1, b1, w3, b3


if __name__ == "__main__":
    key = jax.random.PRNGKey(0)
    kx, kp = jax.random.split(key)

    # MountainCar-style DQN: state_dim=2 (position, velocity), action_dim=3.
    state_dim, action_dim = 2, 3
    w1, b1, w3, b3 = init_params(kp, state_dim, action_dim)

    def reference(xs):
        return jnp.maximum(xs @ w1 + b1[None, :], 0.0) @ w3 + b3[None, :]

    # Case 1: small batch (single grid step), states in the PyTorch script's ranges.
    batch = 8
    pos = jax.random.uniform(kx, (batch, 1), jnp.float32, -1.2, 0.6)
    vel = jax.random.uniform(jax.random.fold_in(kx, 1), (batch, 1), jnp.float32, -0.07, 0.07)
    x = jnp.concatenate([pos, vel], axis=1)

    q = jax.block_until_ready(dqn_forward(x, w1, b1, w3, b3))
    assert q.shape == (batch, action_dim)
    assert jnp.allclose(q, reference(x), atol=1e-5, rtol=1e-5)

    # Case 2: non-multiple batch exercising the batch grid + padding path.
    batch2 = 40
    x2 = jax.random.uniform(jax.random.fold_in(kx, 2), (batch2, state_dim),
                            jnp.float32, -1.2, 0.6)
    q2 = jax.block_until_ready(dqn_forward(x2, w1, b1, w3, b3, block_b=16))
    assert q2.shape == (batch2, action_dim)
    assert jnp.allclose(q2, reference(x2), atol=1e-5, rtol=1e-5)

    print("KERNEL_OK")
</pallas_src>

<mosaic_0001>
module attributes {stable_mosaic.version = 11 : i64} {
  func.func @_dqn_kernel(%arg0: i32, %arg1: memref<8x2xf32, #tpu.memory_space<vmem>>, %arg2: memref<3x128xf32, #tpu.memory_space<vmem>>, %arg3: memref<128x128xf32, #tpu.memory_space<vmem>>, %arg4: memref<8x128xf32, #tpu.memory_space<vmem>>) attributes {dimension_semantics = [#tpu.dimension_semantics<parallel>], iteration_bounds = array<i64: 1>, scalar_prefetch = 0 : i64, scratch_operands = 0 : i64, tpu.core_type = #tpu.core_type<tc>, window_params = [{transform_indices = @transform_0, window_bounds = array<i64: 8, 2>}, {pipeline_mode = #tpu.pipeline_mode<synchronous>, transform_indices = @transform_1, window_bounds = array<i64: 3, 128>}, {pipeline_mode = #tpu.pipeline_mode<synchronous>, transform_indices = @transform_2, window_bounds = array<i64: 128, 128>}, {transform_indices = @transform_3, window_bounds = array<i64: 8, 128>}]} {
    %c0 = arith.constant 0 : index
    %c0_0 = arith.constant 0 : index
    %0 = vector.load %arg1[%c0, %c0_0] : memref<8x2xf32, #tpu.memory_space<vmem>>, vector<8x2xf32>
    %c0_1 = arith.constant 0 : index
    %c0_2 = arith.constant 0 : index
    %1 = vector.load %arg2[%c0_1, %c0_2] : memref<3x128xf32, #tpu.memory_space<vmem>>, vector<3x128xf32>
    %2 = vector.extract_strided_slice %0 {offsets = [0, 0], sizes = [8, 1], strides = [1, 1]} : vector<8x2xf32> to vector<8x1xf32>
    %3 = vector.extract_strided_slice %1 {offsets = [0, 0], sizes = [1, 128], strides = [1, 1]} : vector<3x128xf32> to vector<1x128xf32>
    %4 = vector.broadcast %2 : vector<8x1xf32> to vector<8x128xf32>
    %5 = vector.broadcast %3 : vector<1x128xf32> to vector<8x128xf32>
    %6 = arith.mulf %4, %5 : vector<8x128xf32>
    %7 = vector.extract_strided_slice %0 {offsets = [0, 1], sizes = [8, 1], strides = [1, 1]} : vector<8x2xf32> to vector<8x1xf32>
    %8 = vector.extract_strided_slice %1 {offsets = [1, 0], sizes = [1, 128], strides = [1, 1]} : vector<3x128xf32> to vector<1x128xf32>
    %9 = vector.broadcast %7 : vector<8x1xf32> to vector<8x128xf32>
    %10 = vector.broadcast %8 : vector<1x128xf32> to vector<8x128xf32>
    %11 = arith.mulf %9, %10 : vector<8x128xf32>
    %12 = arith.addf %6, %11 : vector<8x128xf32>
    %13 = vector.extract_strided_slice %1 {offsets = [2, 0], sizes = [1, 128], strides = [1, 1]} : vector<3x128xf32> to vector<1x128xf32>
    %14 = vector.broadcast %13 : vector<1x128xf32> to vector<8x128xf32>
    %15 = arith.addf %12, %14 : vector<8x128xf32>
    %cst = arith.constant 0.000000e+00 : f32
    %16 = vector.broadcast %cst : f32 to vector<8x128xf32>
    %17 = arith.maximumf %15, %16 : vector<8x128xf32>
    %c0_3 = arith.constant 0 : index
    %c0_4 = arith.constant 0 : index
    %18 = vector.load %arg3[%c0_3, %c0_4] : memref<128x128xf32, #tpu.memory_space<vmem>>, vector<128x128xf32>
    %cst_5 = arith.constant dense<0.000000e+00> : vector<8x128xf32>
    %19 = tpu.matmul %17, %18, %cst_5 {dimension_numbers = #tpu.dot_dimension_numbers<[1], [0], [0], [1], [0, 0, 1, 1], [], []>} : vector<8x128xf32>, vector<128x128xf32>, vector<8x128xf32> -> vector<8x128xf32>
    %c0_6 = arith.constant 0 : index
    %c0_7 = arith.constant 0 : index
    %20 = vector.load %arg4[%c0_6, %c0_7] : memref<8x128xf32, #tpu.memory_space<vmem>>, vector<8x128xf32>
    tpu.vector_store %arg4[%c0_6, %c0_7], %19 {strides = array<i32>} : memref<8x128xf32, #tpu.memory_space<vmem>>, vector<8x128xf32>,
    return
  }
  func.func @transform_0(%arg0: i32) -> (i32, i32) {
    %c0_i32 = arith.constant 0 : i32
    %c0_i32_0 = arith.constant 0 : i32
    return %arg0, %c0_i32 : i32, i32
  }
  func.func @transform_1(%arg0: i32) -> (i32, i32) {
    %c0_i32 = arith.constant 0 : i32
    %c0_i32_0 = arith.constant 0 : i32
    %c0_i32_1 = arith.constant 0 : i32
    return %c0_i32, %c0_i32_0 : i32, i32
  }
  func.func @transform_2(%arg0: i32) -> (i32, i32) {
    %c0_i32 = arith.constant 0 : i32
    %c0_i32_0 = arith.constant 0 : i32
    %c0_i32_1 = arith.constant 0 : i32
    return %c0_i32, %c0_i32_0 : i32, i32
  }
  func.func @transform_3(%arg0: i32) -> (i32, i32) {
    %c0_i32 = arith.constant 0 : i32
    %c0_i32_0 = arith.constant 0 : i32
    return %arg0, %c0_i32 : i32, i32
  }
}

</mosaic_0001>

<bundles_post_ra>
// kernel: tpu_custom_call.1
= control target key start
LH: loop header
LB: loop body
LE: loop exit
PB: predicated region body
PF: predicated region fallthrough
CT: control target
= control target key end

     0   :  { %8 = vsyncpa [#allocation3], 0  ;;  %s202_s0 = inlined_call_operand.vmem [shape: f32[8,2], index: 0, kind: input, shape index: {}]   ;;  %s203_s1 = inlined_call_operand.vmem [shape: f32[3,128], index: 1, kind: input, shape index: {}]   ;;  %s204_s2 = inlined_call_operand.hbm [shape: f32[128,128], index: 2, kind: input, shape index: {}]   ;;  %s205_s3 = inlined_call_operand.hbm [shape: f32[8,128], index: 3, kind: output, shape index: {}]  }
   0x1   :  { %9 = vsyncpa [#allocation4], 0  ;;  %s18_s14 = sshll.u32 %s204_s2, 4  ;;  %s164_s15 = smov [#allocation2]   ;;  %s19_s14 = int_to_ptr.hbm [resolvable:$true] %s18_s14 }
   0x2   :  { %s20_s16 = sshll.u32 %s164_s15, 4  ;;  %s165_s17 = smov 128   ;;  %s21_s16 = int_to_ptr.vmem [resolvable:$true] %s20_s16 }
   0x3   :  { %s166_s18 = smov 8  }
   0x4   :  { %26 = dma.hbm_to_vmem [thread:$0]  %s19_s14, 2048, %s21_s16, [#allocation3], %s165_s17, %s165_s17, %s166_s18  }
   0x5   :  { %160 = dma.done.wait [#allocation3], 2048  }
   0x6   :  { %161 = vsyncadd [#allocation3], 4294965248  ;;  %v167_v0 = vmov 0   ;;  %v31_v1 = vld [vmem:[%s202_s0] sm:$0xff]  ;;  %v65_v2 = vld [vmem:[#allocation2 + $0x78] sm:$0xff]  ;;  %v168_v8 = vmov 1  }
   0x7   :  { %110 = vset.pattern.permute.xlu0 %v167_v0  ;;  %v64_v3 = vld [vmem:[#allocation2 + $0x70] sm:$0xff]  ;;  %66 = vmatpush.msra.mxu0 %v65_v2  ;;  %v63_v4 = vld [vmem:[#allocation2 + $0x68] sm:$0xff]  ;;  %v62_v5 = vld [vmem:[#allocation2 + $0x60] sm:$0xff]  ;;  %s169_s21 = smov [#allocation5]   ;;  %s94_s25 = sshll.u32 %s205_s3, 4  ;;  %s95_s25 = int_to_ptr.hbm [resolvable:$true] %s94_s25 }
   0x8   :  { %35 = vperm.xlu0 %110, %v31_v1   ;;  %v61_v6 = vld [vmem:[#allocation2 + $0x58] sm:$0xff]  ;;  %v60_v7 = vld [vmem:[#allocation2 + $0x50] sm:$0xff]  ;;  %v59_v9 = vld [vmem:[#allocation2 + $0x48] sm:$0xff]  ;;  %s92_s22 = sshll.u32 %s169_s21, 4  ;;  %s93_s22 = int_to_ptr.vmem [resolvable:$true] %s92_s22 }
   0x9   :  { %67 = vmatpush.msra.mxu0 %v64_v3  ;;  %v58_v10 = vld [vmem:[#allocation2 + $0x40] sm:$0xff]  ;;  %v57_v11 = vld [vmem:[#allocation2 + $0x38] sm:$0xff]  ;;  %v56_v12 = vld [vmem:[#allocation2 + $0x30] sm:$0xff] }
   0xa   :  { %v55_v13 = vld [vmem:[#allocation2 + $0x28] sm:$0xff]  ;;  %v54_v14 = vld [vmem:[#allocation2 + $0x20] sm:$0xff]  ;;  %v53_v15 = vld [vmem:[#allocation2 + $0x18] sm:$0xff] }
   0xb   :  { %68 = vmatpush.msra.mxu0 %v63_v4  ;;  %v52_v16 = vld [vmem:[#allocation2 + $0x10] sm:$0xff]  ;;  %v51_v17 = vld [vmem:[#allocation2 + $0x8] sm:$0xff]  ;;  %v50_v18 = vld [vmem:[#allocation2] sm:$0xff] }
   0xc   :  { %v32_v20 = vld [vmem:[%s203_s1] sm:$0x7] }
   0xd   :  { %69 = vmatpush.msra.mxu0 %v62_v5  ;;  %v38_v21 = vperm.slane %v32_v20, 0  ;;  %v44_v22 = vperm.slane %v32_v20, 1  ;;  %v47_v26 = vperm.slane %v32_v20, 2 }
   0xf   :  { %70 = vmatpush.msra.mxu0 %v61_v6 }
  0x10   :  { %111 = vset.pattern.permute.xlu0 %v168_v8 }
  0x11   :  { %41 = vperm.xlu0 %111, %v31_v1   ;;  %71 = vmatpush.msra.mxu0 %v60_v7 }
  0x13   :  { %72 = vmatpush.msra.mxu0 %v59_v9 }
  0x15   :  { %73 = vmatpush.msra.mxu0 %v58_v10 }
  0x17   :  { %74 = vmatpush.msra.mxu0 %v57_v11 }
  0x19   :  { %75 = vmatpush.msra.mxu0 %v56_v12 }
  0x1b   :  { %76 = vmatpush.msra.mxu0 %v55_v13 }
  0x1d   :  { %77 = vmatpush.msra.mxu0 %v54_v14 }
  0x1f   :  { %78 = vmatpush.msra.mxu0 %v53_v15 }
  0x21   :  { %79 = vmatpush.msra.mxu0 %v52_v16 }
  0x23   :  { %80 = vmatpush.msra.mxu0 %v51_v17 }
  0x25   :  { %81 = vmatpush.msra.mxu0 %v50_v18 }
  0x7a   :  { %v36_v19 = vpop.permute.xlu0 %35 }
  0x7b   :  { %v39_v24 = vmul.f32 %v38_v21, %v36_v19 }
  0x83   :  { %v42_v23 = vpop.permute.xlu0 %41 }
  0x84   :  { %v45_v25 = vmul.f32 %v44_v22, %v42_v23 }
  0x86   :  { %v46_v27 = vadd.f32 %v45_v25, %v39_v24 }
  0x88   :  { %v48_v28 = vadd.f32 %v47_v26, %v46_v27 }
  0x8a   :  { %v49_v29 = vmax.f32 %v48_v28, 0.0 }
  0x8c   :  { %82 = vmatmul.f32.vlgmr.msra.gmra.mxu0 %v49_v29 }
 0x109   :  { %v83_v30 = vpop.f32.mrf.mxu0 }
 0x10a   :  { %86 = vst [vmem:[#allocation5] sm:$0xff] %v83_v30 }
 0x10b   :  { %97 = dma.vmem_to_hbm [thread:$0]  %s93_s22, 128, %s95_s25, [#allocation4]  }
 0x10c   :  { %162 = dma.done.wait [#allocation4], 128  }
 0x10d   :  { %163 = vsyncadd [#allocation4], 4294967168 }
 0x10e   :  { %102 = vsyncpa [#allocation3], 1 }
 0x10f   :  { %103 = vsyncpa [#allocation4], 1 }

</bundles_post_ra>
